<compile_context>
chip_gen: v7x
topology: tpu7x:2x2x1
jax: 0.10.0
libtpu: 0.0.40
codegen_flags: <defaults>
</compile_context>

<pallas_src>
import numpy as np
import jax
import jax.numpy as jnp
from jax.experimental import pallas as pl
from jax.experimental.pallas import tpu as pltpu


# ----------------------------- Pallas kernel ------------------------------
def dae_kernel(x_ref, wc_ref, bc_ref,
               w2_ref, bl2_ref,
               w3_ref, bl3_ref,
               m2_ref, b2_ref,
               out_ref):
    # (conv1 ∘ Linear1) fused into one bf16 matmul, f32 accumulate, bias + ReLU in f32
    h = jnp.dot(x_ref[...], wc_ref[...],
                preferred_element_type=jnp.float32) + bc_ref[...]
    h = jnp.maximum(h, 0.0)
    # Linear2 + ReLU
    h = jnp.dot(h.astype(jnp.bfloat16), w2_ref[...],
                preferred_element_type=jnp.float32) + bl2_ref[...]
    h = jnp.maximum(h, 0.0)
    # Linear3 + ReLU
    h = jnp.dot(h.astype(jnp.bfloat16), w3_ref[...],
                preferred_element_type=jnp.float32) + bl3_ref[...]
    h = jnp.maximum(h, 0.0)
    # output conv expressed as lane-padded matmul (no activation; target_norm='z-norm')
    out_ref[...] = jnp.dot(h.astype(jnp.bfloat16), m2_ref[...],
                           preferred_element_type=jnp.float32) + b2_ref[...]


def dae_forward_pallas(x, params, L, F, A, tb=128):
    """x: (B, L, F) float32  ->  y_pred: (B, A, L) float32."""
    assert tb % 8 == 0
    B = x.shape[0]

    # channel-major flatten (matches x.permute(0,2,1) then conv/flatten order)
    x_flat = jnp.transpose(x, (0, 2, 1)).reshape(B, F * L)
    B_pad = pl.cdiv(B, tb) * tb
    if B_pad != B:
        x_flat = jnp.pad(x_flat, ((0, B_pad - B), (0, 0)))
    x_flat = x_flat.astype(jnp.bfloat16)          # bf16 matmul inputs

    weights = (params["Wc"], params["bc"],
               params["W2t"], params["bl2"],
               params["W3t"], params["bl3"],
               params["M2p"], params["b2p"])
    n_out_pad = params["M2p"].shape[1]            # multiple of 128 (lane-dense store)

    # Activation tiles move per grid step; weights have constant block index
    # -> stay VMEM-resident across the whole grid.
    in_specs = [pl.BlockSpec((tb, F * L), lambda i: (i, 0))]
    in_specs += [pl.BlockSpec(w.shape, lambda i: (0, 0)) for w in weights]
    out_specs = pl.BlockSpec((tb, n_out_pad), lambda i: (i, 0))

    # Explicit VMEM budget: 2x per buffer (double-buffered), + f32 intermediates.
    w_bytes = sum(int(np.prod(w.shape)) * np.dtype(w.dtype).itemsize for w in weights)
    act_bytes = tb * F * L * 2 + tb * n_out_pad * 4 + 3 * tb * (8 * L) * 4
    vmem_limit = int(min(max(2 * (w_bytes + act_bytes) + (8 << 20), 32 << 20), 64 << 20))

    out_flat = pl.pallas_call(
        dae_kernel,
        out_shape=jax.ShapeDtypeStruct((B_pad, n_out_pad), jnp.float32),
        grid=(B_pad // tb,),
        in_specs=in_specs,
        out_specs=out_specs,
        compiler_params=pltpu.CompilerParams(
            dimension_semantics=("parallel",),    # batch tiles independent -> megacore
            vmem_limit_bytes=vmem_limit),
    )(x_flat, *weights)

    return out_flat[:B, :A * L].reshape(B, A, L)


# ------------------------- parameter construction -------------------------
def conv1d_as_matrix(w, b, L, pad_left=2):
    """Conv1d(kernel=K, stride=1) over a sequence padded (pad_left, K-1-pad_left)
    lowered to a dense (C_in*L, C_out*L) matrix acting on the c-major flat layout."""
    w = np.asarray(w)
    C_out, C_in, K = w.shape
    M = np.zeros((C_in * L, C_out * L), dtype=np.float32)
    for co in range(C_out):
        for ci in range(C_in):
            for k in range(K):
                for t in range(L):
                    tp = t + k - pad_left
                    if 0 <= tp < L:
                        M[ci * L + tp, co * L + t] = w[co, ci, k]
    b_vec = np.repeat(np.asarray(b), L).astype(np.float32)
    return jnp.asarray(M), jnp.asarray(b_vec)[None, :]


def init_dae_params(key, L, F, A):
    ks = jax.random.split(key, 10)
    H = 8 * L
    scale = 0.05
    # torch-layout weights
    w_conv1 = scale * jax.random.normal(ks[0], (8, F, 4), jnp.float32)
    b_conv1 = scale * jax.random.normal(ks[1], (8,), jnp.float32)
    w_l1 = scale * jax.random.normal(ks[2], (H, H), jnp.float32)     # (out, in)
    b_l1 = scale * jax.random.normal(ks[3], (H,), jnp.float32)
    w_l2 = scale * jax.random.normal(ks[4], (128, H), jnp.float32)
    b_l2 = scale * jax.random.normal(ks[5], (128,), jnp.float32)
    w_l3 = scale * jax.random.normal(ks[6], (H, 128), jnp.float32)
    b_l3 = scale * jax.random.normal(ks[7], (H,), jnp.float32)
    w_out = scale * jax.random.normal(ks[8], (A, 8, 4), jnp.float32)
    b_out = scale * jax.random.normal(ks[9], (A,), jnp.float32)

    # conv1/output conv as dense matrices on the channel-major flat layout
    M1, b1_vec = conv1d_as_matrix(w_conv1, b_conv1, L, pad_left=2)
    M2, b2_vec = conv1d_as_matrix(w_out, b_out, L, pad_left=2)

    # --- fold conv1 into Linear1 (exact: no activation between them) ---
    W1t = jnp.asarray(w_l1).T                      # (in=8L, out=8L)
    bl1 = jnp.asarray(b_l1)[None, :]
    Wc = (M1 @ W1t)                                # (F*L, 8L), f32 fold
    bc = (b1_vec @ W1t) + bl1                      # (1, 8L)

    # --- pad output-conv matmul to a 128-lane-dense store ---
    n_out = A * L
    n_out_pad = pl.cdiv(n_out, 128) * 128
    M2p = jnp.pad(M2, ((0, 0), (0, n_out_pad - n_out)))
    b2p = jnp.pad(b2_vec, ((0, 0), (0, n_out_pad - n_out)))

    kernel_params = {
        # bf16 matmul operands, f32 biases (bias-add/ReLU epilogue stays f32)
        "Wc": Wc.astype(jnp.bfloat16), "bc": bc.astype(jnp.float32),
        "W2t": jnp.asarray(w_l2).T.astype(jnp.bfloat16),
        "bl2": jnp.asarray(b_l2)[None, :].astype(jnp.float32),
        "W3t": jnp.asarray(w_l3).T.astype(jnp.bfloat16),
        "bl3": jnp.asarray(b_l3)[None, :].astype(jnp.float32),
        "M2p": M2p.astype(jnp.bfloat16), "b2p": b2p.astype(jnp.float32),
    }
    torch_params = {
        "w_conv1": w_conv1, "b_conv1": b_conv1,
        "w_l1": w_l1, "b_l1": b_l1,
        "w_l2": w_l2, "b_l2": b_l2,
        "w_l3": w_l3, "b_l3": b_l3,
        "w_out": w_out, "b_out": b_out,
    }
    return kernel_params, torch_params


# -------------------------- pure-JAX reference -----------------------------
def dae_forward_ref(x, p, L):
    """Faithful f32 re-implementation of DAE.forward (target_norm='z-norm')."""
    B = x.shape[0]
    xp = jnp.transpose(x, (0, 2, 1))                      # (B, F, L)
    xp = jnp.pad(xp, ((0, 0), (0, 0), (2, 1)))            # F.pad(..., (2,1))
    h = jax.lax.conv_general_dilated(
        xp, p["w_conv1"], window_strides=(1,), padding="VALID",
        dimension_numbers=("NCH", "OIH", "NCH")) + p["b_conv1"][None, :, None]
    h = h.reshape(B, -1)                                  # Flatten (c-major)
    h = jax.nn.relu(h @ p["w_l1"].T + p["b_l1"])
    h = jax.nn.relu(h @ p["w_l2"].T + p["b_l2"])
    h = jax.nn.relu(h @ p["w_l3"].T + p["b_l3"])
    h = h.reshape(B, 8, L)
    h = jnp.pad(h, ((0, 0), (0, 0), (2, 1)))
    y = jax.lax.conv_general_dilated(
        h, p["w_out"], window_strides=(1,), padding="VALID",
        dimension_numbers=("NCH", "OIH", "NCH")) + p["b_out"][None, :, None]
    return y


# --------------------------------- main ------------------------------------
if __name__ == "__main__":
    # batch, sequence_length (in_size), features, appliances
    # (batch is tiled over the grid in 128-row MXU-friendly tiles)
    B, L, F, A = 256, 16, 1, 1
    key = jax.random.PRNGKey(0)
    k_x, k_p = jax.random.split(key)

    x = jax.random.normal(k_x, (B, L, F), jnp.float32)
    kernel_params, torch_params = init_dae_params(k_p, L, F, A)

    y = dae_forward_pallas(x, kernel_params, L, F, A, tb=128)
    y = jax.block_until_ready(y)

    y_ref = jax.block_until_ready(dae_forward_ref(x, torch_params, L))
    # bf16 matmul inputs with f32 accumulation -> modest tolerance vs f32 ref
    np.testing.assert_allclose(np.asarray(y), np.asarray(y_ref), rtol=2e-2, atol=1e-2)

    assert y.shape == (B, A, L)
    print("KERNEL_OK")
</pallas_src>

<mosaic_0001>
module attributes {stable_mosaic.version = 11 : i64} {
  func.func @dae_kernel(%arg0: i32, %arg1: memref<128x16xbf16, #tpu.memory_space<vmem>>, %arg2: memref<16x128xbf16, #tpu.memory_space<vmem>>, %arg3: memref<1x128xf32, #tpu.memory_space<vmem>>, %arg4: memref<128x128xbf16, #tpu.memory_space<vmem>>, %arg5: memref<1x128xf32, #tpu.memory_space<vmem>>, %arg6: memref<128x128xbf16, #tpu.memory_space<vmem>>, %arg7: memref<1x128xf32, #tpu.memory_space<vmem>>, %arg8: memref<128x128xbf16, #tpu.memory_space<vmem>>, %arg9: memref<1x128xf32, #tpu.memory_space<vmem>>, %arg10: memref<128x128xf32, #tpu.memory_space<vmem>>) attributes {dimension_semantics = [#tpu.dimension_semantics<parallel>], iteration_bounds = array<i64: 2>, scalar_prefetch = 0 : i64, scratch_operands = 0 : i64, tpu.core_type = #tpu.core_type<tc>, window_params = [{transform_indices = @transform_0, window_bounds = array<i64: 128, 16>}, {pipeline_mode = #tpu.pipeline_mode<synchronous>, transform_indices = @transform_1, window_bounds = array<i64: 16, 128>}, {pipeline_mode = #tpu.pipeline_mode<synchronous>, transform_indices = @transform_2, window_bounds = array<i64: 1, 128>}, {pipeline_mode = #tpu.pipeline_mode<synchronous>, transform_indices = @transform_3, window_bounds = array<i64: 128, 128>}, {pipeline_mode = #tpu.pipeline_mode<synchronous>, transform_indices = @transform_4, window_bounds = array<i64: 1, 128>}, {pipeline_mode = #tpu.pipeline_mode<synchronous>, transform_indices = @transform_5, window_bounds = array<i64: 128, 128>}, {pipeline_mode = #tpu.pipeline_mode<synchronous>, transform_indices = @transform_6, window_bounds = array<i64: 1, 128>}, {pipeline_mode = #tpu.pipeline_mode<synchronous>, transform_indices = @transform_7, window_bounds = array<i64: 128, 128>}, {pipeline_mode = #tpu.pipeline_mode<synchronous>, transform_indices = @transform_8, window_bounds = array<i64: 1, 128>}, {transform_indices = @transform_9, window_bounds = array<i64: 128, 128>}]} {
    %c0 = arith.constant 0 : index
    %c0_0 = arith.constant 0 : index
    %0 = vector.load %arg1[%c0, %c0_0] : memref<128x16xbf16, #tpu.memory_space<vmem>>, vector<128x16xbf16>
    %c0_1 = arith.constant 0 : index
    %c0_2 = arith.constant 0 : index
    %1 = vector.load %arg2[%c0_1, %c0_2] : memref<16x128xbf16, #tpu.memory_space<vmem>>, vector<16x128xbf16>
    %cst = arith.constant dense<0.000000e+00> : vector<128x128xf32>
    %2 = tpu.matmul %0, %1, %cst {dimension_numbers = #tpu.dot_dimension_numbers<[1], [0], [0], [1], [0, 0, 1, 1], [], []>} : vector<128x16xbf16>, vector<16x128xbf16>, vector<128x128xf32> -> vector<128x128xf32>
    %c0_3 = arith.constant 0 : index
    %c0_4 = arith.constant 0 : index
    %3 = vector.load %arg3[%c0_3, %c0_4] : memref<1x128xf32, #tpu.memory_space<vmem>>, vector<1x128xf32>
    %4 = vector.broadcast %3 : vector<1x128xf32> to vector<128x128xf32>
    %5 = arith.addf %2, %4 : vector<128x128xf32>
    %cst_5 = arith.constant 0.000000e+00 : f32
    %6 = vector.broadcast %cst_5 : f32 to vector<128x128xf32>
    %7 = arith.maximumf %5, %6 : vector<128x128xf32>
    %8 = arith.truncf %7 : vector<128x128xf32> to vector<128x128xbf16>
    %c0_6 = arith.constant 0 : index
    %c0_7 = arith.constant 0 : index
    %9 = vector.load %arg4[%c0_6, %c0_7] : memref<128x128xbf16, #tpu.memory_space<vmem>>, vector<128x128xbf16>
    %cst_8 = arith.constant dense<0.000000e+00> : vector<128x128xf32>
    %10 = tpu.matmul %8, %9, %cst_8 {dimension_numbers = #tpu.dot_dimension_numbers<[1], [0], [0], [1], [0, 0, 1, 1], [], []>} : vector<128x128xbf16>, vector<128x128xbf16>, vector<128x128xf32> -> vector<128x128xf32>
    %c0_9 = arith.constant 0 : index
    %c0_10 = arith.constant 0 : index
    %11 = vector.load %arg5[%c0_9, %c0_10] : memref<1x128xf32, #tpu.memory_space<vmem>>, vector<1x128xf32>
    %12 = vector.broadcast %11 : vector<1x128xf32> to vector<128x128xf32>
    %13 = arith.addf %10, %12 : vector<128x128xf32>
    %cst_11 = arith.constant 0.000000e+00 : f32
    %14 = vector.broadcast %cst_11 : f32 to vector<128x128xf32>
    %15 = arith.maximumf %13, %14 : vector<128x128xf32>
    %16 = arith.truncf %15 : vector<128x128xf32> to vector<128x128xbf16>
    %c0_12 = arith.constant 0 : index
    %c0_13 = arith.constant 0 : index
    %17 = vector.load %arg6[%c0_12, %c0_13] : memref<128x128xbf16, #tpu.memory_space<vmem>>, vector<128x128xbf16>
    %cst_14 = arith.constant dense<0.000000e+00> : vector<128x128xf32>
    %18 = tpu.matmul %16, %17, %cst_14 {dimension_numbers = #tpu.dot_dimension_numbers<[1], [0], [0], [1], [0, 0, 1, 1], [], []>} : vector<128x128xbf16>, vector<128x128xbf16>, vector<128x128xf32> -> vector<128x128xf32>
    %c0_15 = arith.constant 0 : index
    %c0_16 = arith.constant 0 : index
    %19 = vector.load %arg7[%c0_15, %c0_16] : memref<1x128xf32, #tpu.memory_space<vmem>>, vector<1x128xf32>
    %20 = vector.broadcast %19 : vector<1x128xf32> to vector<128x128xf32>
    %21 = arith.addf %18, %20 : vector<128x128xf32>
    %cst_17 = arith.constant 0.000000e+00 : f32
    %22 = vector.broadcast %cst_17 : f32 to vector<128x128xf32>
    %23 = arith.maximumf %21, %22 : vector<128x128xf32>
    %24 = arith.truncf %23 : vector<128x128xf32> to vector<128x128xbf16>
    %c0_18 = arith.constant 0 : index
    %c0_19 = arith.constant 0 : index
    %25 = vector.load %arg8[%c0_18, %c0_19] : memref<128x128xbf16, #tpu.memory_space<vmem>>, vector<128x128xbf16>
    %cst_20 = arith.constant dense<0.000000e+00> : vector<128x128xf32>
    %26 = tpu.matmul %24, %25, %cst_20 {dimension_numbers = #tpu.dot_dimension_numbers<[1], [0], [0], [1], [0, 0, 1, 1], [], []>} : vector<128x128xbf16>, vector<128x128xbf16>, vector<128x128xf32> -> vector<128x128xf32>
    %c0_21 = arith.constant 0 : index
    %c0_22 = arith.constant 0 : index
    %27 = vector.load %arg9[%c0_21, %c0_22] : memref<1x128xf32, #tpu.memory_space<vmem>>, vector<1x128xf32>
    %28 = vector.broadcast %27 : vector<1x128xf32> to vector<128x128xf32>
    %29 = arith.addf %26, %28 : vector<128x128xf32>
    %c0_23 = arith.constant 0 : index
    %c0_24 = arith.constant 0 : index
    %30 = vector.load %arg10[%c0_23, %c0_24] : memref<128x128xf32, #tpu.memory_space<vmem>>, vector<128x128xf32>
    tpu.vector_store %arg10[%c0_23, %c0_24], %29 {strides = array<i32>} : memref<128x128xf32, #tpu.memory_space<vmem>>, vector<128x128xf32>,
    return
  }
  func.func @transform_0(%arg0: i32) -> (i32, i32) {
    %c0_i32 = arith.constant 0 : i32
    %c0_i32_0 = arith.constant 0 : i32
    return %arg0, %c0_i32 : i32, i32
  }
  func.func @transform_1(%arg0: i32) -> (i32, i32) {
    %c0_i32 = arith.constant 0 : i32
    %c0_i32_0 = arith.constant 0 : i32
    %c0_i32_1 = arith.constant 0 : i32
    return %c0_i32, %c0_i32_0 : i32, i32
  }
  func.func @transform_2(%arg0: i32) -> (i32, i32) {
    %c0_i32 = arith.constant 0 : i32
    %c0_i32_0 = arith.constant 0 : i32
    %c0_i32_1 = arith.constant 0 : i32
    return %c0_i32, %c0_i32_0 : i32, i32
  }
  func.func @transform_3(%arg0: i32) -> (i32, i32) {
    %c0_i32 = arith.constant 0 : i32
    %c0_i32_0 = arith.constant 0 : i32
    %c0_i32_1 = arith.constant 0 : i32
    return %c0_i32, %c0_i32_0 : i32, i32
  }
  func.func @transform_4(%arg0: i32) -> (i32, i32) {
    %c0_i32 = arith.constant 0 : i32
    %c0_i32_0 = arith.constant 0 : i32
    %c0_i32_1 = arith.constant 0 : i32
    return %c0_i32, %c0_i32_0 : i32, i32
  }
  func.func @transform_5(%arg0: i32) -> (i32, i32) {
    %c0_i32 = arith.constant 0 : i32
    %c0_i32_0 = arith.constant 0 : i32
    %c0_i32_1 = arith.constant 0 : i32
    return %c0_i32, %c0_i32_0 : i32, i32
  }
  func.func @transform_6(%arg0: i32) -> (i32, i32) {
    %c0_i32 = arith.constant 0 : i32
    %c0_i32_0 = arith.constant 0 : i32
    %c0_i32_1 = arith.constant 0 : i32
    return %c0_i32, %c0_i32_0 : i32, i32
  }
  func.func @transform_7(%arg0: i32) -> (i32, i32) {
    %c0_i32 = arith.constant 0 : i32
    %c0_i32_0 = arith.constant 0 : i32
    %c0_i32_1 = arith.constant 0 : i32
    return %c0_i32, %c0_i32_0 : i32, i32
  }
  func.func @transform_8(%arg0: i32) -> (i32, i32) {
    %c0_i32 = arith.constant 0 : i32
    %c0_i32_0 = arith.constant 0 : i32
    %c0_i32_1 = arith.constant 0 : i32
    return %c0_i32, %c0_i32_0 : i32, i32
  }
  func.func @transform_9(%arg0: i32) -> (i32, i32) {
    %c0_i32 = arith.constant 0 : i32
    %c0_i32_0 = arith.constant 0 : i32
    return %arg0, %c0_i32 : i32, i32
  }
}

</mosaic_0001>

<bundles_post_ra>
// kernel: tpu_custom_call.1
= control target key start
LH: loop header
LB: loop body
LE: loop exit
PB: predicated region body
PF: predicated region fallthrough
CT: control target
= control target key end

     0   :  { %14 = vsyncpa [#allocation3], 0  ;;  %s1986_s0 = inlined_call_operand.vmem [shape: bf16[256,16], index: 0, kind: input, shape index: {}]   ;;  %s1987_s1 = inlined_call_operand.vmem [shape: bf16[16,128], index: 1, kind: input, shape index: {}]   ;;  %s1988_s2 = inlined_call_operand.vmem [shape: f32[1,128], index: 2, kind: input, shape index: {}]   ;;  %s1989_s3 = inlined_call_operand.vmem [shape: bf16[128,128], index: 3, kind: input, shape index: {}]   ;;  %s1990_s4 = inlined_call_operand.vmem [shape: f32[1,128], index: 4, kind: input, shape index: {}]   ;;  %s1991_s5 = inlined_call_operand.vmem [shape: bf16[128,128], index: 5, kind: input, shape index: {}]   ;;  %s1992_s6 = inlined_call_operand.vmem [shape: f32[1,128], index: 6, kind: input, shape index: {}]   ;;  %s1993_s7 = inlined_call_operand.hbm [shape: bf16[128,128], index: 7, kind: input, shape index: {}]   ;;  %s1994_s8 = inlined_call_operand.vmem [shape: f32[1,128], index: 8, kind: input, shape index: {}]   ;;  %s1995_s9 = inlined_call_operand.hbm [shape: f32[256,128], index: 9, kind: output, shape index: {}]  }
   0x1   :  { %15 = vsyncpa [#allocation4], 0 }
   0x2   :  { %17 = vsyncpa [#allocation4 + $0x1], 0  ;;  %s1709_s30 = smov 0   ;;  %s1711_s10 = smov 0  }
   0x3   :  { %s1713_s11 = smov 0   ;;  %s1715_s12 = smov 0  }
   0x4 LB: > { %s1730_s13 = sadd.s32 4294967295, %s1651_s12   ;;  %s1223_s14 = sadd.s32 4294967294, %s1651_s12   ;;  %s1651_s12 = sphi %s1715_s12, %s2011_s12   ;;  %s1647_s11 = sphi %s1713_s11, %s2010_s11   ;;  %s1643_s10 = sphi %s1711_s10, %s2009_s10   ;;  %s1639_s30 = sphi %s1709_s30, %s2008_s30  }
   0x5   : > { %s1734_s15 = sadd.s32 1, %s1651_s12   ;;  %s224_s16 = sadd.s32 1, %s1647_s11 }
   0x6   : > { %s221_s17 = ssub.s32 %s1651_s12, %s1734_s15  ;;  %p234_p0 = scmp.ne.s32.totalorder %s1647_s11, %s1643_s10 }
   0x7   : > { %p222_p1 = scmp.eq.s32.totalorder %s221_s17, 0  ;;  %p235_p2 = scmp.eq.s32.totalorder %s1730_s13, 1 }
   0x8   : > { %p240_p3 = scmp.ne.s32.totalorder %s1643_s10, %s1639_s30  ;;  %p241_p4 = scmp.eq.s32.totalorder %s1223_s14, 1 }
   0x9   : > { %s1745_s18 = scalar_select %p222_p1, %s1647_s11, %s224_s16  }
   0xa   : > { %p1747_p5 = por %p235_p2, %p234_p0  ;;  %p1751_p6 = por %p241_p4, %p240_p3 }
   0xb   : > { %p1224_p7 = scmp.ge.s32.totalorder %s1651_s12, 1  ;;  %p248_p8 = scmp.lt.s32.totalorder %s1651_s12, 3 }
   0xc   : > { %s1999_s19 = scalar_select %p1747_p5, 1, 0 }
   0xd   : > { %s2000_s20 = scalar_select %p1751_p6, 1, 0 }
   0xe   : > { %p1996_p9 = scmp.eq.s32.totalorder %s1730_s13, 0  ;;  %p1758_p10 = pnand %p1224_p7, %p248_p8 }
   0xf   : > { %s1653_s22 = smov [#allocation2]   ;;  %s1557_s27 = scalar_lea.hbm %s1993_s7, 1024 }
  0x10   : > { %s2001_s21 = scalar_select %p1758_p10, 1, 0 }
  0x11   : > { %s278_s23 = sshll.u32 %s1653_s22, 4  ;;  %p1476_p11 = pneg %p1758_p10  ;;  %s279_s23 = int_to_ptr.vmem [resolvable:$true] %s278_s23 }
  0x12   : > { %p1558_p13 = scmp.ne.s32.totalorder %s1993_s7, %s1557_s27  ;;  %p1564_p3 = scmp.lt.u32.totalorder %s1557_s27, %s1993_s7 }
  0x13   : > { %p1766_p12 = pnand %p1996_p9, %p1476_p11 }
  0x15   : > { %p1559_p0 = pneg %p1766_p12 }
  0x17   : > { %p1560_p1 = pnand %p1559_p0, %p1558_p13 }
  0x19   : > { %p1561_p2 = pneg %p1560_p1 }
  0x1b   : > { %p1566_p4 = pnand %p1564_p3, %p1561_p2 }
  0x1d   : > { %1569 = shalt.err (!%p1566_p4)
}
  0x1e   : > { %s1570_s17 = scalar_lea.vmem %s279_s23, 1024  ;;  %p1578_p9 = scmp.lt.s32.totalorder %s279_s23, %s279_s23 }
  0x1f   : > { %p1571_p7 = scmp.ne.s32.totalorder %s279_s23, %s1570_s17  ;;  %p1579_p6 = scmp.lt.s32.totalorder %s1570_s17, %s1570_s17 }
  0x21   : > { %p1573_p8 = pnand %p1571_p7, %p1559_p0  ;;  %p1580_p5 = por %p1579_p6, %p1578_p9 }
  0x23   : > { %p1574_p11 = pneg %p1573_p8 }
  0x25   : > { %p1581_p10 = pnand %p1580_p5, %p1574_p11 }
  0x27   : > { %1584 = shalt.err (!%p1581_p10)
}
  0x28   : > { %s1654_s22 = smov 64   ;;  %s1655_s25 = smov 4  }
  0x29   : > { %1479 = dma.hbm_to_vmem [thread:$0]  (!%p1766_p12), %s1993_s7, 1024, %s279_s23, [#allocation3], %s1654_s22, %s1654_s22, %s1655_s25  }
  0x2a   : > { %p2003_p13 = scmp.ne.s32.totalorder %s2001_s21, 0 }
  0x2b   : > { %p2004_p1 = scmp.eq.s32.totalorder (!%p2003_p13), %s1730_s13, 0 }
  0x2c   : > { %306 = sbr.rel (%p2003_p13) target bundleno = 982 (0x3d6), region = 56 }
  0x33   : > { %1630 = dma.done.wait (%p2004_p1), [#allocation3], 1024   ;;  %p2005_p0 = pmov %p2004_p1 }
  0x34   : > { %s1230_s27 = sshll.u32 %s1730_s13, 4  ;;  %v1524_v0 = vld [vmem:[%s1987_s1] sm:$0xff]   ;;  %vm421_vm0 = vcmask 130048   ;;  %v1534_v6 = vld [vmem:[%s1989_s3 + $0x8] sm:$0xff]   ;;  %v1535_v8 = vld [vmem:[%s1989_s3 + $0x10] sm:$0xff]   ;;  %s339_s26 = sand.u32 1, %s1643_s10  }
  0x35   : > { %1632 = vsyncadd (%p2005_p0), [#allocation3], 4294966272  ;;  %p343_p5 = scmp.lt.s32.totalorder %s1230_s27, 31  ;;  %1340 = vmatprep.subr.bf16.mxu0 %v1524_v0  ;;  %v1533_v5 = vld [vmem:[%s1989_s3] sm:$0xff]   ;;  %v1536_v9 = vld [vmem:[%s1989_s3 + $0x18] sm:$0xff]   ;;  %s1229_s28 = sshll.u32 %s339_s26, 7 }
  0x36   : > { %1341 = vmatpush3.bf16.msra.mxu0 %v1524_v0  ;;  %1358 = vmatprep.subr.bf16.mxu1 %v1533_v5  ;;  %v1537_v12 = vld [vmem:[%s1989_s3 + $0x20] sm:$0xff]   ;;  %v1538_v13 = vld [vmem:[%s1989_s3 + $0x28] sm:$0xff]   ;;  %v1539_v15 = vld [vmem:[%s1989_s3 + $0x30] sm:$0xff]   ;;  %s1282_s14 = sshll.u32 %s1730_s13, 11  ;;  %s1945_s13 = scalar_lea.sflag [#allocation4], %s339_s26 }
  0x37   : > { %s2013_s27 = smov (!%p343_p5, %s1230_s27), 31  ;;  %1359 = vmatpush3.bf16.msra.mxu1 %v1533_v5  ;;  %v1540_v16 = vld [vmem:[%s1989_s3 + $0x38] sm:$0xff]   ;;  %v1541_v17 = vld [vmem:[%s1991_s5] sm:$0xff]   ;;  %v1542_v18 = vld [vmem:[%s1991_s5 + $0x8] sm:$0xff]   ;;  %s1936_s21 = scalar_lea.hbm %s1995_s9, %s1282_s14 }
  0x38   : > { %s1231_s29 = sshll.u32 %s2013_s27, 2  ;;  %1360 = vmatprep.subr.bf16.mxu1 %v1534_v6  ;;  %1390 = vmatprep.subr.bf16.mxu0 %v1541_v17  ;;  %v1543_v19 = vld [vmem:[%s1991_s5 + $0x10] sm:$0xff]   ;;  %v1544_v20 = vld [vmem:[%s1991_s5 + $0x18] sm:$0xff]   ;;  %v1545_v21 = vld [vmem:[%s1991_s5 + $0x20] sm:$0xff]   ;;  %p2006_p9 = scmp.ne.s32.totalorder %s1999_s19, 0 }
  0x39   : > { %s1796_s16 = scalar_lea.vmem %s1986_s0, %s1231_s29  ;;  %v1546_v22 = vld [vmem:[%s1991_s5 + $0x28] sm:$0xff]   ;;  %v1232_v23 = vld [vmem:[%s1988_s2] ss:$0 sm:$0xff]  ;;  %s1916_s29 = scalar_lea.vmem [#allocation5], %s1229_s28 }
  0x3a   : > { %v1525_v1 = vld [vmem:[%s1796_s16] sm:$0xff]   ;;  %v1526_v2 = vld [vmem:[%s1796_s16 + $0x8] sm:$0xff]   ;;  %v1527_v3 = vld [vmem:[%s1796_s16 + $0x10] sm:$0xff]   ;;  %s1149_s24 = sshll.u32 %s1916_s29, 4  ;;  %s1656_s25 = smov [#allocation5]   ;;  %s1938_s24 = int_to_ptr.vmem [resolvable:$true] %s1149_s24 }
  0x3b   : > { %1342 = vmatprep.mubr.msk.bf16.mxu0 %vm421_vm0, %v1525_v1  ;;  %v1528_v4 = vld [vmem:[%s1796_s16 + $0x18] sm:$0xff]   ;;  %v1529_v7 = vld [vmem:[%s1796_s16 + $0x20] sm:$0xff]   ;;  %v1530_v10 = vld [vmem:[%s1796_s16 + $0x28] sm:$0xff]   ;;  %1361 = vmatpush3.bf16.msra.mxu1 %v1534_v6  ;;  %s1585_s22 = scalar_lea.vmem %s1938_s24, 2048  ;;  %s1589_s28 = sshll.u32 %s1656_s25, 4  ;;  %s1590_s28 = int_to_ptr.vmem [resolvable:$false] %s1589_s28 }
  0x3c   : > { %1343 = vmatmul.mubr.msk.bf16.vlgmr.msra.gmra.mrb[0].mxu0 %vm421_vm0, %v1526_v2  ;;  %v1531_v11 = vld [vmem:[%s1796_s16 + $0x30] sm:$0xff]   ;;  %1362 = vmatprep.subr.bf16.mxu1 %v1535_v8  ;;  %v1532_v14 = vld [vmem:[%s1796_s16 + $0x38] sm:$0xff]   ;;  %p1586_p6 = scmp.ne.s32.totalorder %s1938_s24, %s1585_s22  ;;  %s1591_s16 = scalar_lea.vmem %s1590_s28, 4096 }
  0x3d   : > { %1346 = vmatprep.mubr.msk.bf16.mxu0 %vm421_vm0, %v1527_v3  ;;  %1391 = vmatpush3.bf16.msra.mxu0 %v1541_v17  ;;  %v1548_v17 = vld [vmem:[%s1991_s5 + $0x38] sm:$0xff]   ;;  %p1592_p2 = scmp.lt.s32.totalorder %s1938_s24, %s1590_s28  ;;  %p1593_p3 = scmp.lt.s32.totalorder %s1591_s16, %s1585_s22 }
  0x3e   : > { %1392 = vmatprep.subr.bf16.mxu0 %v1542_v18  ;;  %p1587_p10 = pnand %p1586_p6, %p2006_p9 }
  0x3f   : > { %1363 = vmatpush3.bf16.msra.mxu1 %v1535_v8  ;;  %p1594_p4 = por %p1593_p3, %p1592_p2 }
  0x40   : > { %1364 = vmatprep.subr.bf16.mxu1 %v1536_v9  ;;  %p1588_p12 = pneg %p1587_p10 }
  0x41   : > { %1393 = vmatpush3.bf16.msra.mxu0 %v1542_v18  ;;  %v1549_v18 = vld [vmem:[#allocation2] sm:$0xff]  }
  0x42   : > { %1394 = vmatprep.subr.bf16.mxu0 %v1543_v19  ;;  %p1595_p7 = pnand %p1594_p4, %p1588_p12 }
  0x43   : > { %1365 = vmatpush3.bf16.msra.mxu1 %v1536_v9 }
  0x44   : > { %1347 = vmatmul.mubr.msk.bf16.gmra.mrb[4].mxu0 %vm421_vm0, %v1528_v4  ;;  %1366 = vmatprep.subr.bf16.mxu1 %v1537_v12 }
  0x45   : > { %1350 = vmatprep.mubr.msk.bf16.mxu0 %vm421_vm0, %v1529_v7  ;;  %1395 = vmatpush3.bf16.msra.mxu0 %v1543_v19  ;;  %v1550_v19 = vld [vmem:[#allocation2 + $0x8] sm:$0xff]  }
  0x46   : > { %1396 = vmatprep.subr.bf16.mxu0 %v1544_v20 }
  0x47   : > { %1367 = vmatpush3.bf16.msra.mxu1 %v1537_v12 }
  0x48   : > { %1368 = vmatprep.subr.bf16.mxu1 %v1538_v13 }
  0x49   : > { %1397 = vmatpush3.bf16.msra.mxu0 %v1544_v20  ;;  %v1551_v20 = vld [vmem:[#allocation2 + $0x10] sm:$0xff]  }
  0x4a   : > { %1398 = vmatprep.subr.bf16.mxu0 %v1545_v21 }
  0x4b   : > { %1369 = vmatpush3.bf16.msra.mxu1 %v1538_v13 }
  0x4c   : > { %1351 = vmatmul.mubr.msk.bf16.gmra.mrb[8].mxu0 %vm421_vm0, %v1530_v10  ;;  %1370 = vmatprep.subr.bf16.mxu1 %v1539_v15 }
  0x4d   : > { %1354 = vmatprep.mubr.msk.bf16.mxu0 %vm421_vm0, %v1531_v11  ;;  %1399 = vmatpush3.bf16.msra.mxu0 %v1545_v21  ;;  %v1868_v21 = vld [vmem:[#allocation2 + $0x18] sm:$0xff]  }
  0x4e   : > { %1400 = vmatprep.subr.bf16.mxu0 %v1546_v22 }
  0x4f   : > { %1371 = vmatpush3.bf16.msra.mxu1 %v1539_v15 }
  0x50   : > { %1372 = vmatprep.subr.bf16.mxu1 %v1540_v16 }
  0x51   : > { %1401 = vmatpush3.bf16.msra.mxu0 %v1546_v22  ;;  %v1871_v22 = vld [vmem:[#allocation2 + $0x20] sm:$0xff]  }
  0x53   : > { %1373 = vmatpush3.bf16.msra.mxu1 %v1540_v16  ;;  %v1547_v16 = vld [vmem:[%s1991_s5 + $0x30] sm:$0xff]  }
  0x54   : > { %1355 = vmatmul.mubr.msk.bf16.gmra.mrb[12].mxu0 %vm421_vm0, %v1532_v14  ;;  %1402 = vmatprep.subr.bf16.mxu0 %v1547_v16 }
  0x55   : > { %1403 = vmatpush3.bf16.msra.mxu0 %v1547_v16  ;;  %1454 = vmatprep.subr.bf16.mxu1 %v1549_v18 }
  0x56   : > { %1404 = vmatprep.subr.bf16.mxu0 %v1548_v17 }
  0x59   : > { %1405 = vmatpush3.bf16.msra.mxu0 %v1548_v17  ;;  %v1555_v17 = vld [vmem:[#allocation2 + $0x30] sm:$0xff]  }
  0x5a   : > { %1422 = vmatprep.subr.bf16.mxu0 %v1549_v18 }
 0x10f   : > { %v1344_v24 = vpop.f32.mrb[0].mxu0 }
 0x110   : > { %v489_v25 = vadd.f32 %v1344_v24, %v1232_v23  ;;  %v480_v26 = vpop.f32.mrb[1].mxu0  ;;  %v1883_v24 = vld [vmem:[%s1990_s4] ss:$0 sm:$0xff] }
 0x111   : > { %v481_v27 = vadd.f32 %v1232_v23, %v480_v26  ;;  %v1345_v28 = vpop.f32.mrb[2].mxu0 }
 0x112   : > { %v492_v29 = vadd.f32 %v1345_v28, %v1232_v23  ;;  %v483_v30 = vpop.f32.mrb[3].mxu0  ;;  %v545_v32 = vmax.f32 %v489_v25, 0.0 }
 0x113   : > { %v484_v31 = vadd.f32 %v1232_v23, %v483_v30  ;;  %v543_v34 = vmax.f32 %v481_v27, 0.0 }
 0x114   : > { %v546_v33 = vmax.f32 %v492_v29, 0.0 }
 0x115   : > { %v544_v35 = vmax.f32 %v484_v31, 0.0 }
 0x116   : > { %v560_v36 = vpack.c.bf16 %v546_v33, %v545_v32 }
 0x117   : > { %v1348_v37 = vpop.f32.mrb[4].mxu0  ;;  %v559_v38 = vpack.c.bf16 %v544_v35, %v543_v34 }
 0x118   : > { %v505_v39 = vadd.f32 %v1348_v37, %v1232_v23  ;;  %v496_v40 = vpop.f32.mrb[5].mxu0 }
 0x119   : > { %v497_v41 = vadd.f32 %v1232_v23, %v496_v40  ;;  %v1349_v42 = vpop.f32.mrb[6].mxu0  ;;  %1374 = vmatprep.mubr.bf16.mxu1 %v559_v38 }
 0x11a   : > { %v508_v43 = vadd.f32 %v1349_v42, %v1232_v23  ;;  %v499_v44 = vpop.f32.mrb[7].mxu0  ;;  %1375 = vmatmul.mubr.bf16.vlgmr.msra.gmra.mrb[0].mxu1 %v560_v36  ;;  %v549_v46 = vmax.f32 %v505_v39, 0.0 }
 0x11b   : > { %v500_v45 = vadd.f32 %v1232_v23, %v499_v44  ;;  %v547_v48 = vmax.f32 %v497_v41, 0.0  ;;  %1462 = vmatpush3.bf16.msra.mxu1 %v1549_v18 }
 0x11c   : > { %v550_v47 = vmax.f32 %v508_v43, 0.0  ;;  %1455 = vmatprep.subr.bf16.mxu1 %v1550_v19 }
 0x11d   : > { %v548_v49 = vmax.f32 %v500_v45, 0.0 }
 0x11e   : > { %v562_v50 = vpack.c.bf16 %v550_v47, %v549_v46 }
 0x11f   : > { %v561_v51 = vpack.c.bf16 %v548_v49, %v547_v48  ;;  %v1352_v52 = vpop.f32.mrb[8].mxu0  ;;  %1463 = vmatpush3.bf16.msra.mxu1 %v1550_v19 }
 0x120   : > { %v521_v53 = vadd.f32 %v1352_v52, %v1232_v23  ;;  %v512_v54 = vpop.f32.mrb[9].mxu0  ;;  %1456 = vmatprep.subr.bf16.mxu1 %v1551_v20 }
 0x121   : > { %v513_v55 = vadd.f32 %v1232_v23, %v512_v54  ;;  %v1353_v56 = vpop.f32.mrb[10].mxu0  ;;  %1378 = vmatprep.mubr.bf16.mxu1 %v561_v51 }
 0x122   : > { %v524_v57 = vadd.f32 %v1353_v56, %v1232_v23  ;;  %v515_v58 = vpop.f32.mrb[11].mxu0  ;;  %1379 = vmatmul.mubr.bf16.gmra.mrb[4].mxu1 %v562_v50  ;;  %v553_v60 = vmax.f32 %v521_v53, 0.0 }
 0x123   : > { %v516_v59 = vadd.f32 %v1232_v23, %v515_v58  ;;  %v551_v62 = vmax.f32 %v513_v55, 0.0  ;;  %1464 = vmatpush3.bf16.msra.mxu1 %v1551_v20 }
 0x124   : > { %v554_v61 = vmax.f32 %v524_v57, 0.0  ;;  %1457 = vmatprep.subr.bf16.mxu1 %v1868_v21 }
 0x125   : > { %v552_v63 = vmax.f32 %v516_v59, 0.0 }
 0x126   : > { %v564_v0 = vpack.c.bf16 %v554_v61, %v553_v60 }
 0x127   : > { %v563_v1 = vpack.c.bf16 %v552_v63, %v551_v62  ;;  %v1356_v2 = vpop.f32.mrb[12].mxu0  ;;  %1465 = vmatpush3.bf16.msra.mxu1 %v1868_v21 }
 0x128   : > { %v537_v3 = vadd.f32 %v1356_v2, %v1232_v23  ;;  %v528_v4 = vpop.f32.mrb[13].mxu0  ;;  %1458 = vmatprep.subr.bf16.mxu1 %v1871_v22 }
 0x129   : > { %v529_v5 = vadd.f32 %v1232_v23, %v528_v4  ;;  %v1357_v6 = vpop.f32.mrb[14].mxu0  ;;  %1382 = vmatprep.mubr.bf16.mxu1 %v563_v1 }
 0x12a   : > { %v540_v7 = vadd.f32 %v1357_v6, %v1232_v23  ;;  %v531_v8 = vpop.f32.mrb[15].mxu0  ;;  %1383 = vmatmul.mubr.bf16.gmra.mrb[8].mxu1 %v564_v0  ;;  %v557_v10 = vmax.f32 %v537_v3, 0.0 }
 0x12b   : > { %v532_v9 = vadd.f32 %v1232_v23, %v531_v8  ;;  %v555_v12 = vmax.f32 %v529_v5, 0.0  ;;  %v1875_v23 = vld [vmem:[#allocation2 + $0x28] sm:$0xff]   ;;  %1466 = vmatpush3.bf16.msra.mxu1 %v1871_v22 }
 0x12c   : > { %v558_v11 = vmax.f32 %v540_v7, 0.0  ;;  %1459 = vmatprep.subr.bf16.mxu1 %v1875_v23 }
 0x12d   : > { %v556_v13 = vmax.f32 %v532_v9, 0.0 }
 0x12e   : > { %v566_v14 = vpack.c.bf16 %v558_v11, %v557_v10 }
 0x12f   : > { %v565_v15 = vpack.c.bf16 %v556_v13, %v555_v12  ;;  %1467 = vmatpush3.bf16.msra.mxu1 %v1875_v23 }
 0x130   : > { %1460 = vmatprep.subr.bf16.mxu1 %v1555_v17 }
 0x131   : > { %1386 = vmatprep.mubr.bf16.mxu1 %v565_v15 }
 0x132   : > { %1387 = vmatmul.mubr.bf16.gmra.mrb[12].mxu1 %v566_v14 }
 0x133   : > { %1468 = vmatpush3.bf16.msra.mxu1 %v1555_v17 }
 0x1ed   : > { %v1376_v25 = vpop.f32.mrb[0].mxu1 }
 0x1ee   : > { %v681_v26 = vadd.f32 %v1376_v25, %v1883_v24  ;;  %v672_v27 = vpop.f32.mrb[1].mxu1 }
 0x1ef   : > { %v673_v28 = vadd.f32 %v1883_v24, %v672_v27  ;;  %v1377_v29 = vpop.f32.mrb[2].mxu1 }
 0x1f0   : > { %v684_v30 = vadd.f32 %v1377_v29, %v1883_v24  ;;  %v675_v31 = vpop.f32.mrb[3].mxu1  ;;  %v737_v33 = vmax.f32 %v681_v26, 0.0 }
 0x1f1   : > { %v676_v32 = vadd.f32 %v1883_v24, %v675_v31  ;;  %v735_v35 = vmax.f32 %v673_v28, 0.0 }
 0x1f2   : > { %v738_v34 = vmax.f32 %v684_v30, 0.0 }
 0x1f3   : > { %v736_v36 = vmax.f32 %v676_v32, 0.0 }
 0x1f4   : > { %v752_v37 = vpack.c.bf16 %v738_v34, %v737_v33 }
 0x1f5   : > { %v751_v38 = vpack.c.bf16 %v736_v36, %v735_v35  ;;  %v1380_v39 = vpop.f32.mrb[4].mxu1 }
 0x1f6   : > { %v697_v40 = vadd.f32 %v1380_v39, %v1883_v24  ;;  %v688_v41 = vpop.f32.mrb[5].mxu1 }
 0x1f7   : > { %v689_v42 = vadd.f32 %v1883_v24, %v688_v41  ;;  %v1381_v43 = vpop.f32.mrb[6].mxu1  ;;  %1406 = vmatprep.mubr.bf16.mxu0 %v751_v38 }
 0x1f8   : > { %v700_v44 = vadd.f32 %v1381_v43, %v1883_v24  ;;  %v691_v45 = vpop.f32.mrb[7].mxu1  ;;  %1407 = vmatmul.mubr.bf16.vlgmr.msra.gmra.mrb[16].mxu0 %v752_v37  ;;  %v741_v47 = vmax.f32 %v697_v40, 0.0 }
 0x1f9   : > { %v692_v46 = vadd.f32 %v1883_v24, %v691_v45  ;;  %1423 = vmatpush3.bf16.msra.mxu0 %v1549_v18  ;;  %v739_v49 = vmax.f32 %v689_v42, 0.0  ;;  %v1556_v18 = vld [vmem:[#allocation2 + $0x38] sm:$0xff]  }
 0x1fa   : > { %v742_v48 = vmax.f32 %v700_v44, 0.0  ;;  %1424 = vmatprep.subr.bf16.mxu0 %v1550_v19  ;;  %1461 = vmatprep.subr.bf16.mxu1 %v1556_v18 }
 0x1fb   : > { %v740_v50 = vmax.f32 %v692_v46, 0.0  ;;  %1469 = vmatpush3.bf16.msra.mxu1 %v1556_v18 }
 0x1fc   : > { %v754_v51 = vpack.c.bf16 %v742_v48, %v741_v47 }
 0x1fd   : > { %v753_v52 = vpack.c.bf16 %v740_v50, %v739_v49  ;;  %v1384_v53 = vpop.f32.mrb[8].mxu1  ;;  %1425 = vmatpush3.bf16.msra.mxu0 %v1550_v19  ;;  %v1259_v19 = vld [vmem:[%s1992_s6] ss:$0 sm:$0xff] }
 0x1fe   : > { %v713_v54 = vadd.f32 %v1384_v53, %v1883_v24  ;;  %v704_v55 = vpop.f32.mrb[9].mxu1  ;;  %1426 = vmatprep.subr.bf16.mxu0 %v1551_v20 }
 0x1ff   : > { %v705_v56 = vadd.f32 %v1883_v24, %v704_v55  ;;  %v1385_v57 = vpop.f32.mrb[10].mxu1  ;;  %1410 = vmatprep.mubr.bf16.mxu0 %v753_v52 }
 0x200   : > { %v716_v58 = vadd.f32 %v1385_v57, %v1883_v24  ;;  %v707_v59 = vpop.f32.mrb[11].mxu1  ;;  %1411 = vmatmul.mubr.bf16.gmra.mrb[20].mxu0 %v754_v51  ;;  %v745_v61 = vmax.f32 %v713_v54, 0.0 }
 0x201   : > { %v708_v60 = vadd.f32 %v1883_v24, %v707_v59  ;;  %1427 = vmatpush3.bf16.msra.mxu0 %v1551_v20  ;;  %v743_v63 = vmax.f32 %v705_v56, 0.0 }
 0x202   : > { %v746_v62 = vmax.f32 %v716_v58, 0.0  ;;  %1428 = vmatprep.subr.bf16.mxu0 %v1868_v21 }
 0x203   : > { %v744_v0 = vmax.f32 %v708_v60, 0.0 }
 0x204   : > { %v756_v1 = vpack.c.bf16 %v746_v62, %v745_v61 }
 0x205   : > { %v755_v2 = vpack.c.bf16 %v744_v0, %v743_v63  ;;  %v1388_v3 = vpop.f32.mrb[12].mxu1  ;;  %1429 = vmatpush3.bf16.msra.mxu0 %v1868_v21 }
 0x206   : > { %v729_v4 = vadd.f32 %v1388_v3, %v1883_v24  ;;  %v720_v5 = vpop.f32.mrb[13].mxu1  ;;  %1430 = vmatprep.subr.bf16.mxu0 %v1871_v22 }
 0x207   : > { %v721_v6 = vadd.f32 %v1883_v24, %v720_v5  ;;  %v1389_v7 = vpop.f32.mrb[14].mxu1  ;;  %1414 = vmatprep.mubr.bf16.mxu0 %v755_v2 }
 0x208   : > { %v732_v8 = vadd.f32 %v1389_v7, %v1883_v24  ;;  %v723_v9 = vpop.f32.mrb[15].mxu1  ;;  %1415 = vmatmul.mubr.bf16.gmra.mrb[24].mxu0 %v756_v1  ;;  %v749_v11 = vmax.f32 %v729_v4, 0.0 }
 0x209   : > { %v724_v10 = vadd.f32 %v1883_v24, %v723_v9  ;;  %1431 = vmatpush3.bf16.msra.mxu0 %v1871_v22  ;;  %v747_v13 = vmax.f32 %v721_v6, 0.0 }
 0x20a   : > { %v750_v12 = vmax.f32 %v732_v8, 0.0  ;;  %1432 = vmatprep.subr.bf16.mxu0 %v1875_v23 }
 0x20b   : > { %v748_v14 = vmax.f32 %v724_v10, 0.0 }
 0x20c   : > { %v758_v15 = vpack.c.bf16 %v750_v12, %v749_v11  ;;  %v1268_v12 = vld [vmem:[%s1994_s8] ss:$0 sm:$0xff] }
 0x20d   : > { %v757_v16 = vpack.c.bf16 %v748_v14, %v747_v13  ;;  %1433 = vmatpush3.bf16.msra.mxu0 %v1875_v23 }
 0x20e   : > { %1434 = vmatprep.subr.bf16.mxu0 %v1555_v17 }
 0x20f   : > { %1418 = vmatprep.mubr.bf16.mxu0 %v757_v16 }
 0x210   : > { %1419 = vmatmul.mubr.bf16.gmra.mrb[28].mxu0 %v758_v15 }
 0x211   : > { %1435 = vmatpush3.bf16.msra.mxu0 %v1555_v17 }
 0x212   : > { %1436 = vmatprep.subr.bf16.mxu0 %v1556_v18 }
 0x215   : > { %1437 = vmatpush3.bf16.msra.mxu0 %v1556_v18 }
 0x2cb   : > { %v1408_v20 = vpop.f32.mrb[16].mxu0 }
 0x2cc   : > { %v873_v21 = vadd.f32 %v1408_v20, %v1259_v19  ;;  %v864_v22 = vpop.f32.mrb[17].mxu0 }
 0x2cd   : > { %v865_v23 = vadd.f32 %v1259_v19, %v864_v22  ;;  %v1409_v24 = vpop.f32.mrb[18].mxu0 }
 0x2ce   : > { %v876_v25 = vadd.f32 %v1409_v24, %v1259_v19  ;;  %v867_v26 = vpop.f32.mrb[19].mxu0  ;;  %v929_v28 = vmax.f32 %v873_v21, 0.0 }
 0x2cf   : > { %v868_v27 = vadd.f32 %v1259_v19, %v867_v26  ;;  %v927_v30 = vmax.f32 %v865_v23, 0.0 }
 0x2d0   : > { %v930_v29 = vmax.f32 %v876_v25, 0.0 }
 0x2d1   : > { %v928_v31 = vmax.f32 %v868_v27, 0.0 }
 0x2d2   : > { %v944_v32 = vpack.c.bf16 %v930_v29, %v929_v28 }
 0x2d3   : > { %v943_v33 = vpack.c.bf16 %v928_v31, %v927_v30  ;;  %v1412_v34 = vpop.f32.mrb[20].mxu0 }
 0x2d4   : > { %v889_v35 = vadd.f32 %v1412_v34, %v1259_v19  ;;  %v880_v36 = vpop.f32.mrb[21].mxu0 }
 0x2d5   : > { %v881_v37 = vadd.f32 %v1259_v19, %v880_v36  ;;  %v1413_v38 = vpop.f32.mrb[22].mxu0  ;;  %1438 = vmatprep.mubr.bf16.mxu0 %v943_v33 }
 0x2d6   : > { %v892_v39 = vadd.f32 %v1413_v38, %v1259_v19  ;;  %v883_v40 = vpop.f32.mrb[23].mxu0  ;;  %1439 = vmatmul.mubr.bf16.vlgmr.msra.gmra.mrb[32].mxu0 %v944_v32  ;;  %v933_v42 = vmax.f32 %v889_v35, 0.0 }
 0x2d7   : > { %v884_v41 = vadd.f32 %v1259_v19, %v883_v40  ;;  %v931_v44 = vmax.f32 %v881_v37, 0.0 }
 0x2d8   : > { %v934_v43 = vmax.f32 %v892_v39, 0.0 }
 0x2d9   : > { %v932_v45 = vmax.f32 %v884_v41, 0.0 }
 0x2da   : > { %v946_v46 = vpack.c.bf16 %v934_v43, %v933_v42 }
 0x2db   : > { %v945_v47 = vpack.c.bf16 %v932_v45, %v931_v44  ;;  %v1416_v48 = vpop.f32.mrb[24].mxu0 }
 0x2dc   : > { %v905_v49 = vadd.f32 %v1416_v48, %v1259_v19  ;;  %v896_v50 = vpop.f32.mrb[25].mxu0 }
 0x2dd   : > { %v897_v51 = vadd.f32 %v1259_v19, %v896_v50  ;;  %v1417_v52 = vpop.f32.mrb[26].mxu0  ;;  %1442 = vmatprep.mubr.bf16.mxu1 %v945_v47 }
 0x2de   : > { %v908_v53 = vadd.f32 %v1417_v52, %v1259_v19  ;;  %v899_v54 = vpop.f32.mrb[27].mxu0  ;;  %1443 = vmatmul.mubr.bf16.vlgmr.msra.gmra.mrb[16].mxu1 %v946_v46  ;;  %v937_v56 = vmax.f32 %v905_v49, 0.0 }
 0x2df   : > { %v900_v55 = vadd.f32 %v1259_v19, %v899_v54  ;;  %v935_v58 = vmax.f32 %v897_v51, 0.0 }
 0x2e0   : > { %v938_v57 = vmax.f32 %v908_v53, 0.0 }
 0x2e1   : > { %v936_v59 = vmax.f32 %v900_v55, 0.0 }
 0x2e2   : > { %v948_v60 = vpack.c.bf16 %v938_v57, %v937_v56 }
 0x2e3   : > { %v947_v61 = vpack.c.bf16 %v936_v59, %v935_v58  ;;  %v1420_v62 = vpop.f32.mrb[28].mxu0 }
 0x2e4   : > { %v921_v63 = vadd.f32 %v1420_v62, %v1259_v19  ;;  %v912_v0 = vpop.f32.mrb[29].mxu0 }
 0x2e5   : > { %v913_v1 = vadd.f32 %v1259_v19, %v912_v0  ;;  %v1421_v2 = vpop.f32.mrb[30].mxu0  ;;  %1446 = vmatprep.mubr.bf16.mxu1 %v947_v61 }
 0x2e6   : > { %v924_v3 = vadd.f32 %v1421_v2, %v1259_v19  ;;  %v915_v4 = vpop.f32.mrb[31].mxu0  ;;  %1447 = vmatmul.mubr.bf16.gmra.mrb[20].mxu1 %v948_v60  ;;  %v941_v6 = vmax.f32 %v921_v63, 0.0 }
 0x2e7   : > { %v916_v5 = vadd.f32 %v1259_v19, %v915_v4  ;;  %v939_v8 = vmax.f32 %v913_v1, 0.0 }
 0x2e8   : > { %v942_v7 = vmax.f32 %v924_v3, 0.0 }
 0x2e9   : > { %v940_v9 = vmax.f32 %v916_v5, 0.0 }
 0x2ea   : > { %v950_v10 = vpack.c.bf16 %v942_v7, %v941_v6 }
 0x2eb   : > { %v949_v11 = vpack.c.bf16 %v940_v9, %v939_v8 }
 0x2ed   : > { %1450 = vmatprep.mubr.bf16.mxu1 %v949_v11 }
 0x2ee   : > { %1451 = vmatmul.mubr.bf16.gmra.mrb[24].mxu1 %v950_v10 }
 0x3a9   : > { %v1440_v13 = vpop.f32.mrb[32].mxu0 }
 0x3aa   : > { %v1065_v14 = vadd.f32 %v1440_v13, %v1268_v12  ;;  %v1056_v15 = vpop.f32.mrb[33].mxu0 }
 0x3ab   : > { %v1057_v16 = vadd.f32 %v1268_v12, %v1056_v15  ;;  %v1441_v17 = vpop.f32.mrb[34].mxu0 }
 0x3ac   : > { %1121 = vst [vmem:[%s1916_s29 + $0x10] sm:$0xff] %v1065_v14  ;;  %v1068_v18 = vadd.f32 %v1441_v17, %v1268_v12  ;;  %v1059_v19 = vpop.f32.mrb[35].mxu0 }
 0x3ad   : > { %1119 = vst [vmem:[%s1916_s29] sm:$0xff] %v1057_v16  ;;  %v1060_v20 = vadd.f32 %v1268_v12, %v1059_v19 }
 0x3ae   : > { %1122 = vst [vmem:[%s1916_s29 + $0x18] sm:$0xff] %v1068_v18 }
 0x3af   : > { %1120 = vst [vmem:[%s1916_s29 + $0x8] sm:$0xff] %v1060_v20 }
 0x3b1   : > { %v1444_v21 = vpop.f32.mrb[16].mxu1 }
 0x3b2   : > { %v1081_v22 = vadd.f32 %v1444_v21, %v1268_v12  ;;  %v1072_v23 = vpop.f32.mrb[17].mxu1 }
 0x3b3   : > { %v1073_v24 = vadd.f32 %v1268_v12, %v1072_v23  ;;  %v1445_v25 = vpop.f32.mrb[18].mxu1 }
 0x3b4   : > { %1125 = vst [vmem:[%s1916_s29 + $0x30] sm:$0xff] %v1081_v22  ;;  %v1084_v26 = vadd.f32 %v1445_v25, %v1268_v12  ;;  %v1075_v27 = vpop.f32.mrb[19].mxu1 }
 0x3b5   : > { %1123 = vst [vmem:[%s1916_s29 + $0x20] sm:$0xff] %v1073_v24  ;;  %v1076_v28 = vadd.f32 %v1268_v12, %v1075_v27 }
 0x3b6   : > { %1126 = vst [vmem:[%s1916_s29 + $0x38] sm:$0xff] %v1084_v26 }
 0x3b7   : > { %1124 = vst [vmem:[%s1916_s29 + $0x28] sm:$0xff] %v1076_v28 }
 0x3b9   : > { %v1448_v29 = vpop.f32.mrb[20].mxu1 }
 0x3ba   : > { %v1097_v30 = vadd.f32 %v1448_v29, %v1268_v12  ;;  %v1088_v31 = vpop.f32.mrb[21].mxu1 }
 0x3bb   : > { %v1089_v32 = vadd.f32 %v1268_v12, %v1088_v31  ;;  %v1449_v33 = vpop.f32.mrb[22].mxu1 }
 0x3bc   : > { %1129 = vst [vmem:[%s1916_s29 + $0x50] sm:$0xff] %v1097_v30  ;;  %v1100_v34 = vadd.f32 %v1449_v33, %v1268_v12  ;;  %v1091_v35 = vpop.f32.mrb[23].mxu1 }
 0x3bd   : > { %1127 = vst [vmem:[%s1916_s29 + $0x40] sm:$0xff] %v1089_v32  ;;  %v1092_v36 = vadd.f32 %v1268_v12, %v1091_v35 }
 0x3be   : > { %1130 = vst [vmem:[%s1916_s29 + $0x58] sm:$0xff] %v1100_v34 }
 0x3bf   : > { %1128 = vst [vmem:[%s1916_s29 + $0x48] sm:$0xff] %v1092_v36 }
 0x3c1   : > { %v1452_v37 = vpop.f32.mrb[24].mxu1 }
 0x3c2   : > { %v1113_v38 = vadd.f32 %v1452_v37, %v1268_v12  ;;  %v1104_v39 = vpop.f32.mrb[25].mxu1 }
 0x3c3   : > { %v1105_v40 = vadd.f32 %v1268_v12, %v1104_v39  ;;  %v1453_v41 = vpop.f32.mrb[26].mxu1 }
 0x3c4   : > { %1133 = vst [vmem:[%s1916_s29 + $0x70] sm:$0xff] %v1113_v38  ;;  %v1116_v42 = vadd.f32 %v1453_v41, %v1268_v12  ;;  %v1107_v43 = vpop.f32.mrb[27].mxu1 }
 0x3c5   : > { %1131 = vst [vmem:[%s1916_s29 + $0x60] sm:$0xff] %v1105_v40  ;;  %v1108_v44 = vadd.f32 %v1268_v12, %v1107_v43 }
 0x3c6   : > { %1134 = vst [vmem:[%s1916_s29 + $0x78] sm:$0xff] %v1116_v42 }
 0x3c7   : > { %1132 = vst [vmem:[%s1916_s29 + $0x68] sm:$0xff] %v1108_v44 }
 0x3c8   : > { %1598 = shalt.err (!%p1595_p7)
}
 0x3c9   : > { %s1599_s26 = scalar_lea.hbm %s1936_s21, 2048  ;;  %s1603_s14 = scalar_lea.hbm %s1995_s9, 4096 }
 0x3ca   : > { %p1600_p8 = scmp.ne.s32.totalorder %s1936_s21, %s1599_s26  ;;  %p1604_p1 = scmp.lt.u32.totalorder %s1936_s21, %s1995_s9 }
 0x3cb   : > { %p1605_p0 = scmp.lt.u32.totalorder %s1603_s14, %s1599_s26  ;;  %p1607_p6 = scmp.lt.u32.totalorder %s1599_s26, %s1936_s21 }
 0x3cc   : > { %p1601_p11 = pnand %p1600_p8, %p2006_p9 }
 0x3cd   : > { %p1606_p5 = por %p1605_p0, %p1604_p1 }
 0x3ce   : > { %p1602_p13 = pneg %p1601_p11 }
 0x3cf   : > { %p1608_p10 = por %p1607_p6, %p1606_p5 }
 0x3d1   : > { %p1609_p12 = pnand %p1608_p10, %p1602_p13 }
 0x3d3   : > { %1612 = shalt.err (!%p1609_p12)
}
 0x3d4   : > { %s1657_s22 = smov 128   ;;  %s1658_s25 = smov 8  }
 0x3d5   : > { %1474 = dma.vmem_to_hbm [thread:$0]  (%p2006_p9), %s1938_s24, 2048, %s1936_s21, %s1945_s13, %s1657_s22, %s1657_s22, %s1658_s25  }
 0x3d6 PF: > { %p1486_p2 = scmp.ge.s32.totalorder %s1651_s12, 2  ;;  %s1164_s28 = sand.u32 1, %s1639_s30  }
 0x3d7   : > { %p2007_p3 = scmp.ne.s32.totalorder %s2000_s20, 0  ;;  %s1165_s16 = scalar_lea.sflag [#allocation4], %s1164_s28 }
 0x3d9   : > { %p1481_p4 = pnand %p1486_p2, %p2007_p3 }
 0x3db   : > { %1634 = dma.done.wait (!%p1481_p4), %s1165_s16, 2048  }
 0x3dc   : > { %1636 = vsyncadd (!%p1481_p4), %s1165_s16, 4294965248  ;;  %p20_p7 = scmp.ge.s32.totalorder %s1734_s15, 4   ;;  %s2008_s30 = smov %s1643_s10 }
 0x3dd   : > { %s2009_s10 = smov %s1647_s11  ;;  %s2010_s11 = smov %s1745_s18 }
 0x3de   : > { %s2011_s12 = smov %s1734_s15  ;;  %22 = sbr.rel (!%p20_p7) target bundleno = 4 (0x4), region = 96 }
 0x3e5   :  { %1170 = vsyncpa [#allocation3], 1 }
 0x3e6   :  { %1172 = vsyncpa [#allocation3 + $0x1], 1 }
 0x3e7   :  { %1173 = vsyncpa [#allocation4], 1 }
 0x3e8   :  { %1175 = vsyncpa [#allocation4 + $0x1], 1 }

</bundles_post_ra>
